<compile_context>
chip_gen: v6e
topology: v6e:2x2x1
jax: 0.10.0
libtpu: 0.0.40
codegen_flags: <defaults>
</compile_context>

<pallas_src>
import math

import jax
import jax.numpy as jnp
from jax.experimental import pallas as pl
from jax.experimental.pallas import tpu as pltpu


DEFAULT_EPS = 1e-12

# Tiling heuristics for a memory-bound elementwise pass.
_TARGET_BLOCK_BYTES = 6 * 1024 * 1024    # ~6 MiB x-block; 4x double-buffered ~24 MiB
_VMEM_LIMIT_BYTES = 32 * 1024 * 1024     # <= ~half of v7x physical VMEM per TC
_MIN_SPLIT_BYTES = 2 * 1024 * 1024       # split single-block inputs for v7x megacore


# ----------------------------------------------------------------------------
# Pallas kernel: (x - center) * inv_scale on a (TM, TF) tile.
# center / inv_scale are (1, TF) blocks broadcast over the rows.
# ----------------------------------------------------------------------------
def _robust_scale_kernel(x_ref, c_ref, inv_s_ref, o_ref):
    o_ref[...] = (x_ref[...] - c_ref[...]) * inv_s_ref[...]


def _choose_tiles(n: int, f: int, itemsize: int):
    """Byte-budgeted (TM, TF) tile for an [N, F] elementwise pass."""
    sub = 8 if itemsize >= 4 else (16 if itemsize == 2 else 32)

    # Feature tile: keep the full F whenever a minimal (sub, F) slab fits the
    # budget; otherwise tile F in multiples of 128 (the ragged tail of the
    # last feature block is handled by masked stores -- safe for elementwise).
    if f * itemsize * sub <= _TARGET_BLOCK_BYTES:
        tf = f
    else:
        tf = max(128, (_TARGET_BLOCK_BYTES // (sub * itemsize)) // 128 * 128)

    # Row tile: as many rows as fit the byte budget, rounded to the sublane
    # packing.  No batch padding -- grid uses cdiv and the partial last block
    # relies on masked out-of-bounds stores.
    tm = max(sub, (_TARGET_BLOCK_BYTES // (tf * itemsize)) // sub * sub)

    if tm >= n:
        total_bytes = n * f * itemsize
        if total_bytes > _MIN_SPLIT_BYTES and n >= 2 * sub:
            # Split into >= 2 row blocks so both v7x TensorCores get work.
            half = (n + 1) // 2
            tm = ((half + sub - 1) // sub) * sub
        else:
            # Single row block covering the whole batch (block dim == full
            # array dim is always legal, even when not a multiple of 8).
            tm = n
    return tm, tf


def _robust_scaler_forward_2d(x_flat: jax.Array,
                              center_flat: jax.Array,
                              inv_scale_flat: jax.Array) -> jax.Array:
    """x_flat: [N, F]; center_flat / inv_scale_flat: [1, F] -> [N, F]."""
    n, f = x_flat.shape
    itemsize = jnp.dtype(x_flat.dtype).itemsize
    tm, tf = _choose_tiles(n, f, itemsize)
    grid = (pl.cdiv(n, tm), pl.cdiv(f, tf))

    return pl.pallas_call(
        _robust_scale_kernel,
        out_shape=jax.ShapeDtypeStruct((n, f), x_flat.dtype),
        grid=grid,
        in_specs=[
            pl.BlockSpec((tm, tf), lambda i, j: (i, j)),   # x tile (i, j)
            pl.BlockSpec((1, tf), lambda i, j: (0, j)),    # center (row-resident)
            pl.BlockSpec((1, tf), lambda i, j: (0, j)),    # 1/scale (row-resident)
        ],
        out_specs=pl.BlockSpec((tm, tf), lambda i, j: (i, j)),
        compiler_params=pltpu.CompilerParams(
            dimension_semantics=("parallel", "parallel"),
            vmem_limit_bytes=_VMEM_LIMIT_BYTES,
        ),
    )(x_flat, center_flat, inv_scale_flat)


@jax.jit
def robust_scaler_forward(x: jax.Array,
                          center: jax.Array,
                          scale: jax.Array) -> jax.Array:
    """(x - center) / scale with center/scale broadcastable over dim 0."""
    n = x.shape[0]
    f = math.prod(x.shape[1:]) if x.ndim > 1 else 1
    x_flat = x.reshape(n, f)

    feat_shape = (1,) + tuple(x.shape[1:]) if x.ndim > 1 else (1,)
    center_flat = jnp.broadcast_to(
        jnp.asarray(center, x.dtype), feat_shape).reshape(1, f)
    # Exact reciprocal hoisted out of the kernel: computed once on [1, F].
    inv_scale_flat = jnp.broadcast_to(
        1.0 / jnp.asarray(scale, x.dtype), feat_shape).reshape(1, f)

    out = _robust_scaler_forward_2d(x_flat, center_flat, inv_scale_flat)
    return out.reshape(x.shape)


# ----------------------------------------------------------------------------
# Plain-JAX "fit" glue: median / quantiles over the reduce dims.
#   - median follows torch.median (lower middle element, no interpolation)
#   - quantiles follow torch.quantile default (linear interp) == jnp.quantile
# TODO(synk): the sort-based fit has no elementwise Pallas hot path; it stays
# in plain JAX.
# ----------------------------------------------------------------------------
def _torch_median(t: jax.Array, axis: int) -> jax.Array:
    n = t.shape[axis]
    k = (n - 1) // 2
    return jnp.take(jnp.sort(t, axis=axis), jnp.array([k]), axis=axis)


def robust_scaler_fit(data: jax.Array,
                      dim=(0,),
                      quantile_range=(25.0, 75.0),
                      eps=DEFAULT_EPS):
    q_low, q_high = quantile_range[0] / 100.0, quantile_range[1] / 100.0
    median, ql, qh = data, data, data
    for d in sorted(dim, reverse=True):
        median = _torch_median(median, axis=d)
        ql = jnp.quantile(ql, q_low, axis=d, keepdims=True)
        qh = jnp.quantile(qh, q_high, axis=d, keepdims=True)
    iqr = jnp.maximum(qh - ql, eps)
    return median.astype(data.dtype), iqr.astype(data.dtype)


class RobustScalerPallas:
    """Minimal JAX counterpart of mwlab RobustScaler (dim=0 default)."""

    def __init__(self, dim=(0,), quantile_range=(25.0, 75.0), eps=None):
        if isinstance(dim, int):
            dim = (dim,)
        self.dim = tuple(dim) if dim is not None else ()
        self.quantile_range = quantile_range
        self.eps = float(eps) if eps is not None else DEFAULT_EPS
        # buffers default to scalars, like register_buffer(torch.tensor(...))
        self.center = jnp.asarray(0.0, jnp.float32)
        self.scale = jnp.asarray(1.0, jnp.float32)

    def fit(self, data: jax.Array):
        self.center, self.scale = robust_scaler_fit(
            data, self.dim, self.quantile_range, self.eps)
        return self

    def forward(self, x: jax.Array) -> jax.Array:
        return robust_scaler_forward(x, self.center, self.scale)

    __call__ = forward

    def inverse(self, z: jax.Array) -> jax.Array:
        # same elementwise pattern; kept in plain JAX (not the requested path)
        return z * jnp.asarray(self.scale, z.dtype) + jnp.asarray(self.center, z.dtype)


if __name__ == "__main__":
    key = jax.random.PRNGKey(0)
    # NCHW input, small shapes: batch=2, channels=4, spatial=16x16
    x = jax.random.normal(key, (2, 4, 16, 16), dtype=jnp.float32) * 3.0 + 1.5

    scaler = RobustScalerPallas(dim=(0,), quantile_range=(25.0, 75.0))
    scaler.fit(x)                      # center/scale shape: [1, 4, 16, 16]

    out = jax.block_until_ready(scaler.forward(x))

    # Reference check in plain JAX
    ref = (x - scaler.center) / scaler.scale
    assert out.shape == x.shape and out.dtype == x.dtype
    assert jnp.allclose(out, ref, rtol=1e-5, atol=1e-5), "mismatch vs reference"

    print("KERNEL_OK")
</pallas_src>

<mosaic_0001>
module attributes {stable_mosaic.version = 11 : i64} {
  func.func @_robust_scale_kernel(%arg0: i32, %arg1: i32, %arg2: memref<2x1024xf32, #tpu.memory_space<vmem>>, %arg3: memref<1x1024xf32, #tpu.memory_space<vmem>>, %arg4: memref<1x1024xf32, #tpu.memory_space<vmem>>, %arg5: memref<2x1024xf32, #tpu.memory_space<vmem>>) attributes {dimension_semantics = [#tpu.dimension_semantics<parallel>, #tpu.dimension_semantics<parallel>], iteration_bounds = array<i64: 1, 1>, scalar_prefetch = 0 : i64, scratch_operands = 0 : i64, tpu.core_type = #tpu.core_type<tc>, window_params = [{transform_indices = @transform_0, window_bounds = array<i64: 2, 1024>}, {transform_indices = @transform_1, window_bounds = array<i64: 1, 1024>}, {transform_indices = @transform_2, window_bounds = array<i64: 1, 1024>}, {transform_indices = @transform_3, window_bounds = array<i64: 2, 1024>}]} {
    %c0 = arith.constant 0 : index
    %c0_0 = arith.constant 0 : index
    %0 = vector.load %arg2[%c0, %c0_0] : memref<2x1024xf32, #tpu.memory_space<vmem>>, vector<2x1024xf32>
    %c0_1 = arith.constant 0 : index
    %c0_2 = arith.constant 0 : index
    %1 = vector.load %arg3[%c0_1, %c0_2] : memref<1x1024xf32, #tpu.memory_space<vmem>>, vector<1x1024xf32>
    %2 = vector.broadcast %1 : vector<1x1024xf32> to vector<2x1024xf32>
    %3 = arith.subf %0, %2 : vector<2x1024xf32>
    %c0_3 = arith.constant 0 : index
    %c0_4 = arith.constant 0 : index
    %4 = vector.load %arg4[%c0_3, %c0_4] : memref<1x1024xf32, #tpu.memory_space<vmem>>, vector<1x1024xf32>
    %5 = vector.broadcast %4 : vector<1x1024xf32> to vector<2x1024xf32>
    %6 = arith.mulf %3, %5 : vector<2x1024xf32>
    %c0_5 = arith.constant 0 : index
    %c0_6 = arith.constant 0 : index
    %7 = vector.load %arg5[%c0_5, %c0_6] : memref<2x1024xf32, #tpu.memory_space<vmem>>, vector<2x1024xf32>
    tpu.vector_store %arg5[%c0_5, %c0_6], %6 {strides = array<i32>} : memref<2x1024xf32, #tpu.memory_space<vmem>>, vector<2x1024xf32>,
    return
  }
  func.func @transform_0(%arg0: i32, %arg1: i32) -> (i32, i32) {
    %c0_i32 = arith.constant 0 : i32
    return %arg0, %arg1 : i32, i32
  }
  func.func @transform_1(%arg0: i32, %arg1: i32) -> (i32, i32) {
    %c0_i32 = arith.constant 0 : i32
    %c0_i32_0 = arith.constant 0 : i32
    return %c0_i32, %arg1 : i32, i32
  }
  func.func @transform_2(%arg0: i32, %arg1: i32) -> (i32, i32) {
    %c0_i32 = arith.constant 0 : i32
    %c0_i32_0 = arith.constant 0 : i32
    return %c0_i32, %arg1 : i32, i32
  }
  func.func @transform_3(%arg0: i32, %arg1: i32) -> (i32, i32) {
    %c0_i32 = arith.constant 0 : i32
    return %arg0, %arg1 : i32, i32
  }
}

</mosaic_0001>

<bundles_post_ra>
// kernel: robust_scaler_forward.1
= control target key start
LH: loop header
LB: loop body
LE: loop exit
PB: predicated region body
PF: predicated region fallthrough
CT: control target
= control target key end

     0   :  { %v18_v0 = vlaneseq  ;;  %v167_v1 = vmov 1983009808   ;;  %s206_s1 = inlined_call_operand.vmem [shape: f32[1,1024], index: 1, kind: input, shape index: {}]   ;;  %s207_s2 = inlined_call_operand.vmem [shape: f32[1,1024], index: 2, kind: input, shape index: {}]   ;;  %s208_s0 = inlined_call_operand.vmem [shape: f32[2,1024], index: 0, kind: input, shape index: {}]   ;;  %s209_s3 = inlined_call_operand.vmem [shape: f32[2,1024], index: 3, kind: output, shape index: {}]  }
   0x1   :  { %v53_v2 = vunpack.c.l.s4 %v167_v1  ;;  %v16_v4 = vld [vmem:[%s206_s1] sm:$0xff]  ;;  %v15_v52 = vld [vmem:[%s208_s0 + $0x8] sm:$0xff] }
   0x2   :  { %v19_v3 = vshrl.u32 %v18_v0, 7  ;;  %v88_v10 = vld [vmem:[%s207_s2] sm:$0xff] }
   0x3   :  { %v54_v5 = vunpack.c.0.s8 %v53_v2  ;;  %v14_v35 = vld [vmem:[%s208_s0] sm:$0xff] }
   0x4   :  { %v20_v6 = vsub.s32 0, %v19_v3  ;;  %v24_v7 = vsub.s32 1, %v19_v3  ;;  %v28_v8 = vsub.s32 2, %v19_v3  ;;  %v32_v9 = vsub.s32 3, %v19_v3 }
   0x5   :  { %v57_v11 = vsub.s32 %v54_v5, %v19_v3  ;;  %v36_v12 = vsub.s32 4, %v19_v3  ;;  %v40_v13 = vsub.s32 5, %v19_v3  ;;  %v44_v14 = vsub.s32 6, %v19_v3 }
   0x6   :  { %v21_v15 = vrot.slane %v16_v4, %v20_v6  ;;  %v25_v16 = vrot.slane %v16_v4, %v24_v7  ;;  %v29_v17 = vrot.slane %v16_v4, %v28_v8  ;;  %v33_v18 = vrot.slane %v16_v4, %v32_v9 }
   0x7   :  { %v93_v19 = vrot.slane %v88_v10, %v20_v6  ;;  %v97_v20 = vrot.slane %v88_v10, %v24_v7  ;;  %v101_v21 = vrot.slane %v88_v10, %v28_v8  ;;  %v105_v22 = vrot.slane %v88_v10, %v32_v9 }
   0x8   :  { %v50_v23 = vcombine.low %v21_v15, %v25_v16  ;;  %v51_v24 = vcombine.low %v29_v17, %v33_v18  ;;  %v37_v25 = vrot.slane %v16_v4, %v36_v12  ;;  %v41_v26 = vrot.slane %v16_v4, %v40_v13 }
   0x9   :  { %v122_v27 = vcombine.low %v93_v19, %v97_v20  ;;  %v123_v28 = vcombine.low %v101_v21, %v105_v22  ;;  %v45_v29 = vrot.slane %v16_v4, %v44_v14  ;;  %v48_v30 = vsub.s32 7, %v19_v3 }
   0xa   :  { %v58_v31 = vrot.slane %v50_v23, %v57_v11  ;;  %v65_v32 = vrot.slane %v51_v24, %v57_v11  ;;  %v67_v33 = vcombine.low %v37_v25, %v41_v26  ;;  %v109_v34 = vrot.slane %v88_v10, %v36_v12 }
   0xb   :  { %v130_v36 = vrot.slane %v122_v27, %v57_v11  ;;  %v137_v37 = vrot.slane %v123_v28, %v57_v11  ;;  %v49_v38 = vrot.slane %v16_v4, %v48_v30  ;;  %v113_v39 = vrot.slane %v88_v10, %v40_v13 }
   0xc   :  { %v66_v40 = vcombine.low %v58_v31, %v65_v32  ;;  %v117_v41 = vrot.slane %v88_v10, %v44_v14  ;;  %v121_v42 = vrot.slane %v88_v10, %v48_v30  ;;  %v75_v45 = vrot.slane %v67_v33, %v57_v11 }
   0xd   :  { %v138_v43 = vcombine.low %v130_v36, %v137_v37  ;;  %v68_v44 = vcombine.low %v45_v29, %v49_v38  ;;  %v139_v46 = vcombine.low %v109_v34, %v113_v39 }
   0xe   :  { %v86_v47 = vsub.f32 %v14_v35, %v66_v40  ;;  %v140_v48 = vcombine.low %v117_v41, %v121_v42 }
   0xf   :  { %v82_v49 = vrot.slane %v68_v44, %v57_v11  ;;  %v147_v50 = vrot.slane %v139_v46, %v57_v11 }
  0x10   :  { %v158_v51 = vmul.f32 %v138_v43, %v86_v47  ;;  %v154_v53 = vrot.slane %v140_v48, %v57_v11 }
  0x11   :  { %v83_v54 = vcombine.low %v75_v45, %v82_v49 }
  0x12   :  { %160 = vst [vmem:[%s209_s3] sm:$0xff] %v158_v51  ;;  %v155_v55 = vcombine.low %v147_v50, %v154_v53 }
  0x13   :  { %v87_v56 = vsub.f32 %v15_v52, %v83_v54 }
  0x15   :  { %v159_v57 = vmul.f32 %v155_v55, %v87_v56 }
  0x17   :  { %161 = vst [vmem:[%s209_s3 + $0x8] sm:$0xff] %v159_v57 }

</bundles_post_ra>
